<compile_context>
chip_gen: v7x
topology: tpu7x:2x2x1
jax: 0.10.0
libtpu: 0.0.40
codegen_flags: <defaults>
</compile_context>

<pallas_src>
import jax
import jax.numpy as jnp
from jax.experimental import pallas as pl
from jax.experimental.pallas import tpu as pltpu


def _linear_kernel(x_ref, w_ref, b_ref, o_ref):
    # x_ref: (TB, D)    VMEM  streamed batch tile (tail block may be ragged)
    # w_ref: (1, D)     VMEM  resident weight row
    # b_ref: (1,)       SMEM  bias scalar
    # o_ref: (TBC, 128) VMEM  chunk-major, lane-dense output slab
    bias = b_ref[0]
    w_row = w_ref[...]                      # (1, D), broadcast across sublanes
    n_chunks = o_ref.shape[0]               # == TB // 128, static

    def chunk_body(c, carry):
        r0 = pl.multiple_of(c * 128, 128)
        x_chunk = x_ref[pl.ds(r0, 128), :]                        # (128, D)
        # VALU multiply + XLU lane reduction (MXU intentionally idle; the
        # kernel is HBM-bound so compute hides under the DMA).
        y = jnp.sum(x_chunk * w_row, axis=-1, keepdims=True)      # (128, 1) f32
        # Column -> lane-dense row: lane-broadcast, then a square XLU
        # transpose; yb.T[0, j] == y[j].
        yb = jnp.broadcast_to(y, (128, 128))
        row = yb.T[0:1, :] + bias                                 # (1, 128)
        # Store one 128-wide row per chunk (dynamic sublane offset only).
        o_ref[pl.ds(c, 1), :] = row.astype(o_ref.dtype)
        return carry

    jax.lax.fori_loop(0, n_chunks, chunk_body, 0)


def linear_regressor(x, w, b):
    """out = x @ w.T + b with PyTorch nn.Linear parameter layout.

    x: (B, D) f32; w: (1, D) f32; b: (1,) f32  ->  (B, 1) f32
    """
    B, D = x.shape
    assert w.shape == (1, D), "weight must be (out_features=1, in_features=D)"
    assert b.shape == (1,)

    # --- generation-aware VMEM budget --------------------------------------
    try:
        vmem_cap = pltpu.get_tpu_info().vmem_capacity_bytes
    except Exception:
        vmem_cap = 64 * 1024 * 1024
    if vmem_cap >= 100 * 1024 * 1024:        # v5e / v6e: 128 MiB physical VMEM
        x_dbuf_budget = 32 * 1024 * 1024
        vmem_limit = 64 * 1024 * 1024
    else:                                    # v7x: 64 MiB physical VMEM
        x_dbuf_budget = 24 * 1024 * 1024
        vmem_limit = 32 * 1024 * 1024

    row_bytes = D * 4
    # Rows per (double-buffered) x block, rounded down to a multiple of 1024
    # so the output block (TB//128, 128) meets the (8, 128) constraint.
    max_rows = (x_dbuf_budget // (2 * row_bytes)) // 1024 * 1024
    max_rows = max(1024, max_rows)

    # Keep >= ~8 grid steps (>= 4 per TensorCore on v7x) unless B is small.
    min_steps = 8
    rows_per_step = (B + min_steps - 1) // min_steps
    target_rows = ((rows_per_step + 1023) // 1024) * 1024
    TB = min(max_rows, target_rows)
    TBC = TB // 128

    grid_len = (B + TB - 1) // TB            # ragged tail handled by Pallas
    B_pad = grid_len * TB
    n_chunks_total = B_pad // 128

    # Very large D could push the x double buffer past the scoped limit; give
    # it headroom (capped well below physical VMEM).
    x_dbuf_bytes = 2 * TB * row_bytes
    vmem_limit = max(vmem_limit,
                     min(int(0.9 * vmem_cap), x_dbuf_bytes + 2 * 1024 * 1024))
    # TODO(synk): if D ever grows so large that a (1024, D) double buffer no
    # longer fits VMEM, add a trailing K grid axis with a VMEM f32 accumulator
    # (pl.when init/finalize), keeping the reduction on the VPU.

    out = pl.pallas_call(
        _linear_kernel,
        out_shape=jax.ShapeDtypeStruct((n_chunks_total, 128), x.dtype),
        grid=(grid_len,),
        in_specs=[
            pl.BlockSpec((TB, D), lambda i: (i, 0)),              # streamed x tile
            pl.BlockSpec((1, D), lambda i: (0, 0)),               # resident weight
            pl.BlockSpec(memory_space=pltpu.MemorySpace.SMEM),    # bias scalar
        ],
        out_specs=pl.BlockSpec((TBC, 128), lambda i: (i, 0)),     # lane-dense slab
        compiler_params=pltpu.CompilerParams(
            dimension_semantics=("parallel",),
            vmem_limit_bytes=vmem_limit,
        ),
        cost_estimate=pl.CostEstimate(
            flops=2 * B_pad * D,
            transcendentals=0,
            bytes_accessed=4 * (B * D + D + B_pad),
        ),
    )(x, w, b)

    # Chunk-major (B_pad//128, 128) -> flat rows -> (B, 1).  Rows >= B come
    # from the ragged last x block (garbage) and are sliced off here.
    return out.reshape(-1)[:B].reshape(B, 1)


if __name__ == "__main__":
    # Batch not a tile multiple -> exercises the ragged tail block and a
    # multi-step (pipelined) grid; inp_size = 128.
    B, D = 2500, 128

    key = jax.random.PRNGKey(0)
    kx, kw, kb = jax.random.split(key, 3)

    # Mimic nn.Linear init: uniform(-1/sqrt(D), 1/sqrt(D)); torch layout (1, D).
    bound = 1.0 / jnp.sqrt(jnp.float32(D))
    x = jax.random.normal(kx, (B, D), dtype=jnp.float32)
    w = jax.random.uniform(kw, (1, D), minval=-bound, maxval=bound, dtype=jnp.float32)
    b = jax.random.uniform(kb, (1,), minval=-bound, maxval=bound, dtype=jnp.float32)

    out = jax.block_until_ready(linear_regressor(x, w, b))

    # Reference in plain JAX.
    ref = x @ w.T + b[0]
    assert out.shape == (B, 1)
    assert jnp.allclose(out, ref, atol=1e-4, rtol=1e-4)

    print("KERNEL_OK")
</pallas_src>

<mosaic_0001>
module attributes {stable_mosaic.version = 11 : i64} {
  func.func @_linear_kernel(%arg0: i32, %arg1: memref<1024x128xf32, #tpu.memory_space<vmem>>, %arg2: memref<1x128xf32, #tpu.memory_space<vmem>>, %arg3: memref<1xf32, #tpu.memory_space<smem>>, %arg4: memref<8x128xf32, #tpu.memory_space<vmem>>) attributes {dimension_semantics = [#tpu.dimension_semantics<parallel>], iteration_bounds = array<i64: 3>, scalar_prefetch = 0 : i64, scratch_operands = 0 : i64, tpu.core_type = #tpu.core_type<tc>, window_params = [{transform_indices = @transform_0, window_bounds = array<i64: 1024, 128>}, {pipeline_mode = #tpu.pipeline_mode<synchronous>, transform_indices = @transform_1, window_bounds = array<i64: 1, 128>}, {transform_indices = @transform_2, window_bounds = array<i64: 1>}, {transform_indices = @transform_3, window_bounds = array<i64: 8, 128>}]} {
    %c0 = arith.constant 0 : index
    %0 = memref.load %arg3[%c0] : memref<1xf32, #tpu.memory_space<smem>>
    %c0_0 = arith.constant 0 : index
    %c0_1 = arith.constant 0 : index
    %1 = vector.load %arg2[%c0_0, %c0_1] : memref<1x128xf32, #tpu.memory_space<vmem>>, vector<1x128xf32>
    %c0_i32 = arith.constant 0 : i32
    %c8_i32 = arith.constant 8 : i32
    %2 = arith.addi %c0_i32, %c8_i32 : i32
    %c1_i32 = arith.constant 1 : i32
    scf.for %arg5 = %c0_i32 to %2 step %c1_i32  : i32 {
      %c128_i32 = arith.constant 128 : i32
      %3 = arith.muli %arg5, %c128_i32 : i32
      %4 = tpu.assume_multiple %3, 128 : i32
      %5 = arith.index_cast %4 : i32 to index
      %c0_3 = arith.constant 0 : index
      %6 = vector.load %arg1[%5, %c0_3] : memref<1024x128xf32, #tpu.memory_space<vmem>>, vector<128x128xf32>
      %7 = vector.broadcast %1 : vector<1x128xf32> to vector<128x128xf32>
      %8 = arith.mulf %6, %7 : vector<128x128xf32>
      %cst = arith.constant dense<0.000000e+00> : vector<128xf32>
      %9 = vector.multi_reduction <add>, %8, %cst [1] : vector<128x128xf32> to vector<128xf32>
      %10 = vector.shape_cast %9 : vector<128xf32> to vector<128x1xf32>
      %11 = vector.shape_cast %10 : vector<128x1xf32> to vector<128x1xf32>
      %12 = vector.broadcast %11 : vector<128x1xf32> to vector<128x128xf32>
      %13 = tpu.transpose %12, [1, 0] : vector<128x128xf32> -> vector<128x128xf32>
      %14 = vector.extract_strided_slice %13 {offsets = [0, 0], sizes = [1, 128], strides = [1, 1]} : vector<128x128xf32> to vector<1x128xf32>
      %15 = vector.broadcast %0 : f32 to vector<1x128xf32>
      %16 = arith.addf %14, %15 : vector<1x128xf32>
      %17 = arith.index_cast %arg5 : i32 to index
      %c0_4 = arith.constant 0 : index
      %18 = vector.load %arg4[%17, %c0_4] : memref<8x128xf32, #tpu.memory_space<vmem>>, vector<1x128xf32>
      tpu.vector_store %arg4[%17, %c0_4], %16 {strides = array<i32>} : memref<8x128xf32, #tpu.memory_space<vmem>>, vector<1x128xf32>,
    }
    %c8_i32_2 = arith.constant 8 : i32
    return
  }
  func.func @transform_0(%arg0: i32) -> (i32, i32) {
    %c0_i32 = arith.constant 0 : i32
    %c0_i32_0 = arith.constant 0 : i32
    return %arg0, %c0_i32 : i32, i32
  }
  func.func @transform_1(%arg0: i32) -> (i32, i32) {
    %c0_i32 = arith.constant 0 : i32
    %c0_i32_0 = arith.constant 0 : i32
    %c0_i32_1 = arith.constant 0 : i32
    return %c0_i32, %c0_i32_0 : i32, i32
  }
  func.func @transform_2(%arg0: i32) -> i32 {
    %c0_i32 = arith.constant 0 : i32
    %c0_i32_0 = arith.constant 0 : i32
    return %c0_i32 : i32
  }
  func.func @transform_3(%arg0: i32) -> (i32, i32) {
    %c0_i32 = arith.constant 0 : i32
    %c0_i32_0 = arith.constant 0 : i32
    return %arg0, %c0_i32 : i32, i32
  }
}

</mosaic_0001>

<bundles_post_ra>
// kernel: tpu_custom_call.1
= control target key start
LH: loop header
LB: loop body
LE: loop exit
PB: predicated region body
PF: predicated region fallthrough
CT: control target
= control target key end

     0   :  { %s925_s0 = inlined_call_operand.hbm [shape: f32[2500,128], index: 0, kind: input, shape index: {}]   ;;  %s926_s1 = inlined_call_operand.hbm [shape: f32[1,128], index: 1, kind: input, shape index: {}]   ;;  %s927_s2 = inlined_call_operand.<no memory space> [shape: f32[1], index: 2, kind: input, shape index: {}]   ;;  %s928_s3 = inlined_call_operand.hbm [shape: f32[24,128], index: 3, kind: output, shape index: {}]  }
   0x1   :  { %8 = sst [smem:[#allocation2]] %s927_s2 }
   0x2   :  { %9 = vsyncpa [#allocation4], 0 }
   0x3   :  { %11 = vsyncpa [#allocation4 + $0x1], 0 }
   0x4   :  { %12 = vsyncpa [#allocation7], 0 }
   0x5   :  { %13 = vsyncpa [#allocation5], 0 }
   0x6   :  { %15 = vsyncpa [#allocation5 + $0x1], 0  ;;  %s679_s14 = smov 0   ;;  %s681_s15 = smov 0  }
   0x7   :  { %s683_s16 = smov 0   ;;  %s685_s17 = smov 0  }
   0x8 LB: > { %s700_s2 = sadd.s32 4294967295, %s645_s17   ;;  %s432_s18 = sadd.s32 4294967294, %s645_s17   ;;  %s645_s17 = sphi %s685_s17, %s949_s17   ;;  %s641_s16 = sphi %s683_s16, %s948_s16   ;;  %s637_s15 = sphi %s681_s15, %s947_s15   ;;  %s633_s14 = sphi %s679_s14, %s946_s14  }
   0x9   : > { %s704_s19 = sadd.s32 1, %s645_s17   ;;  %s28_s20 = sadd.s32 1, %s641_s16 }
   0xa   : > { %s25_s21 = ssub.s32 %s645_s17, %s704_s19  ;;  %p35_p0 = scmp.ne.s32.totalorder %s641_s16, %s637_s15 }
   0xb   : > { %p26_p1 = scmp.eq.s32.totalorder %s25_s21, 0  ;;  %p36_p2 = scmp.eq.s32.totalorder %s645_s17, 0 }
   0xc   : > { %p41_p3 = scmp.ne.s32.totalorder %s637_s15, %s633_s14  ;;  %p929_p4 = scmp.eq.s32.totalorder %s700_s2, 0 }
   0xd   : > { %s716_s22 = scalar_select %p26_p1, %s641_s16, %s28_s20  }
   0xe   : > { %p718_p5 = por %p36_p2, %p35_p0  ;;  %p724_p6 = por %p929_p4, %p41_p3 }
   0xf   : > { %p107_p7 = scmp.eq.s32.totalorder %s700_s2, 2  ;;  %p113_p8 = scmp.eq.s32.totalorder %s432_s18, 2 }
  0x10   : > { %s933_s23 = scalar_select %p718_p5, 1, 0 }
  0x11   : > { %s934_s24 = scalar_select %p724_p6, 1, 0 }
  0x12   : > { %p433_p9 = scmp.ge.s32.totalorder %s645_s17, 1  ;;  %p120_p10 = scmp.lt.s32.totalorder %s645_s17, 4 }
  0x13   : > { %p731_p11 = por %p107_p7, %p35_p0  ;;  %p735_p12 = por %p113_p8, %p41_p3 }
  0x14   : > { %p739_p13 = pnand %p433_p9, %p120_p10  ;;  %s651_s28 = smov [#allocation6]  }
  0x15   : > { %s935_s25 = scalar_select %p731_p11, 1, 0 }
  0x16   : > { %s936_s26 = scalar_select %p735_p12, 1, 0 }
  0x17   : > { %s937_s27 = scalar_select %p739_p13, 1, 0 }
  0x18   : > { %p461_p1 = pneg %p739_p13  ;;  %s133_s29 = sshll.u32 %s651_s28, 4  ;;  %s134_s29 = int_to_ptr.vmem [resolvable:$true] %s133_s29 }
  0x19   : > { %s515_s6 = scalar_lea.hbm %s926_s1, 16 }
  0x1a   : > { %p747_p2 = pnand %p461_p1, %p929_p4  ;;  %p516_p0 = scmp.ne.s32.totalorder %s926_s1, %s515_s6 }
  0x1b   : > { %p522_p9 = scmp.lt.u32.totalorder %s515_s6, %s926_s1 }
  0x1c   : > { %p517_p3 = pneg %p747_p2 }
  0x1e   : > { %p518_p7 = pnand %p517_p3, %p516_p0 }
  0x20   : > { %p519_p8 = pneg %p518_p7 }
  0x22   : > { %p524_p10 = pnand %p522_p9, %p519_p8 }
  0x24   : > { %527 = shalt.err (!%p524_p10)
}
  0x25   : > { %s528_s11 = scalar_lea.vmem %s134_s29, 16  ;;  %s535_s12 = scalar_lea.vmem %s134_s29, 32 }
  0x26   : > { %p529_p1 = scmp.ne.s32.totalorder %s134_s29, %s528_s11  ;;  %p536_p11 = scmp.lt.s32.totalorder %s134_s29, %s134_s29 }
  0x27   : > { %p537_p6 = scmp.lt.s32.totalorder %s535_s12, %s528_s11 }
  0x28   : > { %p531_p4 = pnand %p529_p1, %p517_p3 }
  0x29   : > { %p538_p13 = por %p537_p6, %p536_p11 }
  0x2a   : > { %p532_p12 = pneg %p531_p4 }
  0x2c   : > { %p539_p5 = pnand %p538_p13, %p532_p12 }
  0x2e   : > { %542 = shalt.err (!%p539_p5)
}
  0x2f   : > { %464 = dma.hbm_to_vmem [thread:$0]  (!%p747_p2), %s926_s1, 16, %s134_s29, [#allocation7]  }
  0x30   : > { %p435_p0 = scmp.ge.s32.totalorder %s645_s17, 3 }
  0x31   : > { %p939_p7 = scmp.ne.s32.totalorder (!%p435_p0), %s933_s23, 0 }
  0x32   : > { %143 = sbr.rel (%p435_p0) target bundleno = 92 (0x5c), region = 24 }
  0x39   : > { %146 = sbr.rel (!%p939_p7) target bundleno = 92 (0x5c), region = 28  ;;  %s147_s20 = sand.u32 (%p939_p7), 1, %s641_s16  }
  0x3a   : > { %s437_s21 = sshll.u32 (%p939_p7), %s645_s17, 7  ;;  %s436_s28 = sshll.u32 (%p939_p7), %s147_s20, 10 }
  0x3b   : > { %s153_s4 = ssub.s32 (%p939_p7), 313, %s437_s21  ;;  %s775_s6 = scalar_lea.sflag (%p939_p7), [#allocation4], %s147_s20 }
  0x3c   : > { %p154_p4 = scmp.lt.s32.totalorder (%p939_p7), %s153_s4, 128  ;;  %s151_s29 = scalar_lea.vmem (%p939_p7), [#allocation3], %s436_s28 }
  0x40   : > { %s951_s4 = smov (!%p154_p4, %s153_s4), 128 }
  0x41   : > { %s772_s5 = sshll.u32 %s951_s4, 7 }
  0x42   : > { %s158_s30 = ssub.s32 16384, %s772_s5 }
  0x43   : > { %159 = vsyncadd %s775_s6, %s158_s30  ;;  %p439_p5 = scmp.ne.s32.totalorder %s772_s5, 0  ;;  %s453_s23 = sshll.u32 %s645_s17, 14 }
  0x44   : > { %s783_s9 = scalar_lea.hbm %s925_s0, %s453_s23  ;;  %s164_s10 = sshll.u32 %s151_s29, 4  ;;  %s785_s10 = int_to_ptr.vmem [resolvable:$true] %s164_s10 }
  0x45   : > { %s543_s11 = scalar_lea.hbm %s783_s9, %s772_s5  ;;  %s547_s18 = scalar_lea.hbm %s925_s0, 40064 }
  0x46   : > { %p544_p6 = scmp.ne.s32.totalorder %s783_s9, %s543_s11  ;;  %p548_p13 = scmp.lt.u32.totalorder %s783_s9, %s925_s0 }
  0x47   : > { %p549_p2 = scmp.lt.u32.totalorder %s547_s18, %s543_s11  ;;  %p551_p8 = scmp.lt.u32.totalorder %s543_s11, %s783_s9 }
  0x48   : > { %p545_p11 = pnand %p544_p6, %p439_p5 }
  0x49   : > { %p550_p3 = por %p549_p2, %p548_p13 }
  0x4a   : > { %p546_p12 = pneg %p545_p11 }
  0x4b   : > { %p552_p9 = por %p551_p8, %p550_p3 }
  0x4d   : > { %p553_p10 = pnand %p552_p9, %p546_p12 }
  0x4f   : > { %556 = shalt.err (!%p553_p10)
}
  0x50   : > { %s557_s28 = scalar_lea.vmem %s785_s10, %s772_s5  ;;  %s652_s4 = smov [#allocation3]  }
  0x51   : > { %p558_p1 = scmp.ne.s32.totalorder %s785_s10, %s557_s28  ;;  %s561_s30 = sshll.u32 %s652_s4, 4  ;;  %s562_s30 = int_to_ptr.vmem [resolvable:$false] %s561_s30 }
  0x52   : > { %s563_s29 = scalar_lea.vmem %s562_s30, 32768  ;;  %p564_p4 = scmp.lt.s32.totalorder %s785_s10, %s562_s30 }
  0x53   : > { %p559_p0 = pnand %p558_p1, %p439_p5  ;;  %p565_p6 = scmp.lt.s32.totalorder %s563_s29, %s557_s28 }
  0x55   : > { %p560_p7 = pneg %p559_p0  ;;  %p566_p11 = por %p565_p6, %p564_p4 }
  0x57   : > { %p567_p13 = pnand %p566_p11, %p560_p7 }
  0x59   : > { %570 = shalt.err (!%p567_p13)
}
  0x5a   : > { %s653_s23 = smov 128   ;;  %s654_s7 = smov 8  }
  0x5b   : > { %170 = dma.hbm_to_vmem [thread:$0]  (%p439_p5), %s783_s9, %s772_s5, %s785_s10, %s775_s6, %s653_s23, %s653_s23, %s654_s7  }
  0x5c PF: > { %p940_p12 = scmp.ne.s32.totalorder %s937_s27, 0 }
  0x5d   : > { %s815_s8 = sand.u32 (!%p940_p12), 1, %s637_s15   ;;  %p941_p2 = scmp.ne.s32.totalorder (!%p940_p12), %s934_s24, 0 }
  0x5e   : > { %176 = sbr.rel (%p940_p12) target bundleno = 399 (0x18f), region = 32  ;;  %s444_s11 = sshll.u32 (!%p940_p12), %s815_s8, 10 }
  0x5f   : > { %s179_s12 = scalar_lea.sflag (!%p940_p12), [#allocation4], %s815_s8  ;;  %s819_s13 = scalar_lea.vmem (!%p940_p12), [#allocation3], %s444_s11 }
  0x65   : > { %620 = dma.done.wait (%p941_p2), %s179_s12, 16384  }
  0x66   : > { %622 = vsyncadd (%p941_p2), %s179_s12, 4294950912  ;;  %p942_p5 = scmp.eq.s32.totalorder %s700_s2, 0 }
  0x68   : > { %624 = dma.done.wait (%p942_p5), [#allocation7], 16   ;;  %p943_p3 = pmov %p942_p5 }
  0x69   : > { %s446_s27 = sshll.u32 %s815_s8, 3  ;;  %s830_s5 = sld [smem:[#allocation2]]  ;;  %v832_v0 = vld [vmem:[#allocation6] ss:$0 sm:$0xff] }
  0x6a   : > { %626 = vsyncadd (%p943_p3), [#allocation7], 4294967280  ;;  %s834_s6 = scalar_lea.vmem [#allocation8], %s446_s27  ;;  %s836_s9 = smov 0  }
  0x6b LB: >> { %s447_s24 = sshll.u32 %s649_s9, 7  ;;  %s328_s18 = scalar_lea.vmem %s834_s6, %s649_s9 [#allocation8]  ;;  %s649_s9 = sphi %s836_s9, %s221_s9  }
  0x6c   : >> { %s843_s10 = scalar_lea.vmem %s819_s13, %s447_s24 [#allocation3]  ;;  %s221_s9 = sadd.s32 1, %s649_s9  }
  0x6d   : >> { %v224_v1 = vld [vmem:[%s843_s10] sm:$0xff]  ;;  %v225_v2 = vld [vmem:[%s843_s10 + $0x8] sm:$0xff]  ;;  %v226_v3 = vld [vmem:[%s843_s10 + $0x10] sm:$0xff]  ;;  %p218_p8 = scmp.ge.s32.totalorder %s221_s9, 8  }
  0x6e   : >> { %v246_v4 = vmul.f32 %v832_v0, %v224_v1  ;;  %v248_v5 = vmul.f32 %v832_v0, %v226_v3  ;;  %v227_v6 = vld [vmem:[%s843_s10 + $0x18] sm:$0xff]  ;;  %v247_v7 = vmul.f32 %v832_v0, %v225_v2  ;;  %v228_v9 = vld [vmem:[%s843_s10 + $0x20] sm:$0xff]  ;;  %v229_v10 = vld [vmem:[%s843_s10 + $0x28] sm:$0xff]  ;;  %s450_s20 = sshll.u32 (%p218_p8), %s700_s2, 7  ;;  %s344_s30 = sshll.u32 (%p218_p8), %s834_s6, 4  ;;  %s345_s30 = int_to_ptr.vmem [resolvable:$true] %s344_s30 }
  0x6f   : >> { %v249_v8 = vmul.f32 %v832_v0, %v227_v6  ;;  %v250_v11 = vmul.f32 %v832_v0, %v228_v9  ;;  %v251_v12 = vmul.f32 %v832_v0, %v229_v10  ;;  %v230_v13 = vld [vmem:[%s843_s10 + $0x30] sm:$0xff]  ;;  %v231_v14 = vld [vmem:[%s843_s10 + $0x38] sm:$0xff]  ;;  %v232_v17 = vld [vmem:[%s843_s10 + $0x40] sm:$0xff]  ;;  %v326_v49 = vstv %s830_s5  ;;  %s887_s4 = scalar_lea.hbm (%p218_p8), %s928_s3, %s450_s20  ;;  %s331_s29 = scalar_lea.sflag (%p218_p8), [#allocation5], %s815_s8 }
  0x70   : >> { %262 = vadd.xlane.f32.xlu0 %v246_v4  ;;  %266 = vadd.xlane.f32.xlu1 %v248_v5  ;;  %v252_v15 = vmul.f32 %v832_v0, %v230_v13  ;;  %v253_v16 = vmul.f32 %v832_v0, %v231_v14  ;;  %v233_v18 = vld [vmem:[%s843_s10 + $0x48] sm:$0xff]  ;;  %v254_v19 = vmul.f32 %v832_v0, %v232_v17  ;;  %v234_v21 = vld [vmem:[%s843_s10 + $0x50] sm:$0xff]  ;;  %v235_v22 = vld [vmem:[%s843_s10 + $0x58] sm:$0xff]  ;;  %s571_s23 = scalar_lea.vmem (%p218_p8), %s345_s30, 128  ;;  %p944_p10 = scmp.ne.s32.totalorder (%p218_p8), %s935_s25, 0 }
  0x71   : >> { %v255_v20 = vmul.f32 %v832_v0, %v233_v18  ;;  %v256_v23 = vmul.f32 %v832_v0, %v234_v21  ;;  %v257_v24 = vmul.f32 %v832_v0, %v235_v22  ;;  %v236_v25 = vld [vmem:[%s843_s10 + $0x60] sm:$0xff]  ;;  %v237_v26 = vld [vmem:[%s843_s10 + $0x68] sm:$0xff]  ;;  %v238_v29 = vld [vmem:[%s843_s10 + $0x70] sm:$0xff]  ;;  %p572_p9 = scmp.ne.s32.totalorder (%p218_p8), %s345_s30, %s571_s23  ;;  %s655_s7 = smov (%p218_p8), [#allocation8]  }
  0x72   : >> { %v258_v27 = vmul.f32 %v832_v0, %v236_v25  ;;  %v259_v28 = vmul.f32 %v832_v0, %v237_v26  ;;  %v239_v30 = vld [vmem:[%s843_s10 + $0x78] sm:$0xff]  ;;  %v260_v31 = vmul.f32 %v832_v0, %v238_v29  ;;  %s575_s11 = sshll.u32 (%p218_p8), %s655_s7, 4  ;;  %s576_s11 = int_to_ptr.vmem [resolvable:$false] %s575_s11 }
  0x73   : >> { %v261_v32 = vmul.f32 %v832_v0, %v239_v30  ;;  %p573_p1 = pnand (%p218_p8), %p572_p9, %p944_p10  ;;  %s577_s12 = scalar_lea.vmem (%p218_p8), %s576_s11, 256 }
  0x74   : >> { %264 = vadd.xlane.f32.xlu0 %v247_v7  ;;  %268 = vadd.xlane.f32.xlu1 %v249_v8  ;;  %p578_p7 = scmp.lt.s32.totalorder (%p218_p8), %s345_s30, %s576_s11  ;;  %p579_p4 = scmp.lt.s32.totalorder (%p218_p8), %s577_s12, %s571_s23 }
  0x75   : > { %p574_p0 = pneg (%p218_p8), %p573_p1 }
  0x76   : > { %p580_p6 = por (%p218_p8), %p579_p4, %p578_p7 }
  0x78   : >> { %270 = vadd.xlane.f32.xlu0 %v250_v11  ;;  %272 = vadd.xlane.f32.xlu1 %v251_v12  ;;  %p581_p11 = pnand (%p218_p8), %p580_p6, %p574_p0 }
  0x7c   : >> { %274 = vadd.xlane.f32.xlu0 %v252_v15  ;;  %276 = vadd.xlane.f32.xlu1 %v253_v16 }
  0x80   : >> { %278 = vadd.xlane.f32.xlu0 %v254_v19  ;;  %280 = vadd.xlane.f32.xlu1 %v255_v20 }
  0x84   : >> { %282 = vadd.xlane.f32.xlu0 %v256_v23  ;;  %284 = vadd.xlane.f32.xlu1 %v257_v24 }
  0x88   : >> { %286 = vadd.xlane.f32.xlu0 %v258_v27  ;;  %288 = vadd.xlane.f32.xlu1 %v259_v28 }
  0x8c   : >> { %290 = vadd.xlane.f32.xlu0 %v260_v31  ;;  %292 = vadd.xlane.f32.xlu1 %v261_v32 }
  0xfd   : >> { %v263_v33 = vpop.xlane.xlu0 %262  ;;  %v267_v35 = vpop.xlane.xlu1 %266 }
  0xfe   : >> { %294 = vxpose.xlu0.b32.start [1/16] (narrow) %v263_v33, 8 }
 0x101   : >> { %v265_v34 = vpop.xlane.xlu0 %264  ;;  %v269_v36 = vpop.xlane.xlu1 %268 }
 0x102   : >> { %295 = vxpose.xlu0.b32.cont [2/16] (narrow) %v265_v34, 8 }
 0x105   : >> { %v271_v37 = vpop.xlane.xlu0 %270  ;;  %v273_v38 = vpop.xlane.xlu1 %272 }
 0x106   : >> { %296 = vxpose.xlu0.b32.cont [3/16] (narrow) %v267_v35, 8 }
 0x109   : >> { %v275_v39 = vpop.xlane.xlu0 %274  ;;  %v277_v40 = vpop.xlane.xlu1 %276 }
 0x10a   : >> { %297 = vxpose.xlu0.b32.cont [4/16] (narrow) %v269_v36, 8 }
 0x10d   : >> { %v279_v41 = vpop.xlane.xlu0 %278  ;;  %v281_v42 = vpop.xlane.xlu1 %280 }
 0x10e   : >> { %298 = vxpose.xlu0.b32.cont [5/16] (narrow) %v271_v37, 8 }
 0x111   : >> { %v283_v43 = vpop.xlane.xlu0 %282  ;;  %v285_v44 = vpop.xlane.xlu1 %284 }
 0x112   : >> { %299 = vxpose.xlu0.b32.cont [6/16] (narrow) %v273_v38, 8 }
 0x115   : >> { %v287_v45 = vpop.xlane.xlu0 %286  ;;  %v289_v46 = vpop.xlane.xlu1 %288 }
 0x116   : >> { %300 = vxpose.xlu0.b32.cont [7/16] (narrow) %v275_v39, 8 }
 0x119   : >> { %v291_v47 = vpop.xlane.xlu0 %290  ;;  %v293_v48 = vpop.xlane.xlu1 %292 }
 0x11a   : >> { %301 = vxpose.xlu0.b32.cont [8/16] (narrow) %v277_v40, 8 }
 0x11e   : >> { %302 = vxpose.xlu0.b32.cont [9/16] (narrow) %v279_v41, 8 }
 0x122   : >> { %303 = vxpose.xlu0.b32.cont [10/16] (narrow) %v281_v42, 8 }
 0x126   : >> { %304 = vxpose.xlu0.b32.cont [11/16] (narrow) %v283_v43, 8 }
 0x12a   : >> { %305 = vxpose.xlu0.b32.cont [12/16] (narrow) %v285_v44, 8 }
 0x12e   : >> { %306 = vxpose.xlu0.b32.cont [13/16] (narrow) %v287_v45, 8 }
 0x132   : >> { %307 = vxpose.xlu0.b32.cont [14/16] (narrow) %v289_v46, 8 }
 0x136   : >> { %308 = vxpose.xlu0.b32.cont [15/16] (narrow) %v291_v47, 8 }
 0x13a   : >> { %309 = vxpose.xlu0.b32.end [16/16] (narrow) %v293_v48, 8 }
 0x17b   : > { %220 = sbr.rel (!%p218_p8) target bundleno = 107 (0x6b), region = 90 }
 0x17e   : >> { %v310_v50 = vpop.trf.xlu0 }
 0x17f   : >> { %v327_v51 = vadd.f32 %v326_v49, %v310_v50 }
 0x181   : >> { %329 = vst [vmem:[%s328_s18] sm:$0x1] %v327_v51 }
 0x182   : > { %584 = shalt.err (!%p581_p11)
}
 0x183   : > { %s585_s2 = scalar_lea.hbm %s887_s4, 128  ;;  %s589_s27 = scalar_lea.hbm %s928_s3, 384 }
 0x184   : > { %p586_p13 = scmp.ne.s32.totalorder %s887_s4, %s585_s2  ;;  %p590_p5 = scmp.lt.u32.totalorder %s887_s4, %s928_s3 }
 0x185   : > { %p591_p3 = scmp.lt.u32.totalorder %s589_s27, %s585_s2  ;;  %p593_p9 = scmp.lt.u32.totalorder %s585_s2, %s887_s4 }
 0x186   : > { %p587_p12 = pnand %p586_p13, %p944_p10 }
 0x187   : > { %p592_p8 = por %p591_p3, %p590_p5 }
 0x188   : > { %p588_p2 = pneg %p587_p12 }
 0x189   : > { %p594_p1 = por %p593_p9, %p592_p8 }
 0x18b   : > { %p595_p0 = pnand %p594_p1, %p588_p2 }
 0x18d   : > { %598 = shalt.err (!%p595_p0)
}
 0x18e   : > { %459 = dma.vmem_to_hbm [thread:$0]  (%p944_p10), %s345_s30, 128, %s887_s4, %s331_s29  }
 0x18f PF: > { %p471_p7 = scmp.ge.s32.totalorder %s645_s17, 2  ;;  %s356_s9 = sand.u32 1, %s633_s14  }
 0x190   : > { %p945_p4 = scmp.ne.s32.totalorder %s936_s26, 0  ;;  %s357_s24 = scalar_lea.sflag [#allocation5], %s356_s9 }
 0x192   : > { %p466_p6 = pnand %p471_p7, %p945_p4 }
 0x194   : > { %628 = dma.done.wait (!%p466_p6), %s357_s24, 128  }
 0x195   : > { %630 = vsyncadd (!%p466_p6), %s357_s24, 4294967168  ;;  %p18_p11 = scmp.ge.s32.totalorder %s704_s19, 5   ;;  %s946_s14 = smov %s637_s15 }
 0x196   : > { %s947_s15 = smov %s641_s16  ;;  %s948_s16 = smov %s716_s22 }
 0x197   : > { %s949_s17 = smov %s704_s19  ;;  %20 = sbr.rel (!%p18_p11) target bundleno = 8 (0x8), region = 101 }
 0x19e   :  { %362 = vsyncpa [#allocation4], 1 }
 0x19f   :  { %364 = vsyncpa [#allocation4 + $0x1], 1 }
 0x1a0   :  { %365 = vsyncpa [#allocation7], 1 }
 0x1a1   :  { %366 = vsyncpa [#allocation5], 1 }
 0x1a2   :  { %368 = vsyncpa [#allocation5 + $0x1], 1 }

</bundles_post_ra>
